<compile_context>
chip_gen: v6e
topology: v6e:2x2x1
jax: 0.10.0
libtpu: 0.0.40
codegen_flags: <defaults>
</compile_context>

<pallas_src>
import jax
import jax.numpy as jnp
from jax.experimental import pallas as pl
from jax.experimental.pallas import tpu as pltpu


# --------------------------------------------------------------------------- #
# Kernel
# --------------------------------------------------------------------------- #
def _gap_fc_kernel(x_ref, w_ref, b_ref, o_ref, acc_ref):
    # x_ref:   (TN, TC, HW)   native dtype
    # w_ref:   (TC, O_pad)    native dtype, already scaled by 1/HW
    # b_ref:   (1, O_pad)
    # o_ref:   (TN, O_pad)
    # acc_ref: (TN, O_pad)    f32 accumulator, resident across the C (reduction) axis
    c_step = pl.program_id(1)

    @pl.when(c_step == 0)
    def _():
        acc_ref[...] = jnp.zeros_like(acc_ref)

    # Partial global-average-pool: sum over HW with f32 accumulation (1/HW is
    # pre-folded into the weight), keeping the x block in its native dtype.
    pooled = jnp.sum(x_ref[...], axis=-1, dtype=jnp.float32)          # (TN, TC)

    # Partial FC on the MXU: keep the weight in its native dtype (bf16 stays on
    # the fast MXU path); cast the small pooled operand instead; f32 accumulate.
    w = w_ref[...]
    acc_ref[...] += jnp.dot(pooled.astype(w.dtype), w,
                            preferred_element_type=jnp.float32)

    # Finalize: add bias once, on the last reduction step only.
    @pl.when(c_step == pl.num_programs(1) - 1)
    def _():
        o_ref[...] = (acc_ref[...] + b_ref[...].astype(jnp.float32)).astype(o_ref.dtype)


# --------------------------------------------------------------------------- #
# Tiling / VMEM budgeting
# --------------------------------------------------------------------------- #
def _round_up(v, m):
    return ((v + m - 1) // m) * m


def _divisors_mult8_desc(c):
    return [d for d in range(c, 7, -1) if c % d == 0 and d % 8 == 0]


def _choose_tiles(n, c, hw, o_pad, x_bytes, w_bytes, out_bytes, solve_budget):
    hw_pad = _round_up(hw, 128)  # lane padding of the HW axis inside VMEM

    def tn_budget(tc):
        fixed = 2 * tc * o_pad * w_bytes + 8 * o_pad * 4          # weight (dbl-buf) + bias
        per_tn = 2 * tc * hw_pad * x_bytes + 2 * o_pad * out_bytes + o_pad * 4
        rem = solve_budget - fixed
        return rem // per_tn if rem > 0 else 0

    # --- C (reduction) tiling: prefer full C (weight resident, single reduction
    # step), else a multiple-of-8 divisor of C (no padding), else pad as fallback.
    candidates = [c] + [d for d in _divisors_mult8_desc(c) if d < c]
    tc = None
    for cand in candidates:
        if tn_budget(cand) >= min(n, 8):
            tc = cand
            break
    c_pad = c
    if tc is None:
        # Last resort: zero-pad C (reduction-safe) so small aligned tiles exist.
        tc = 128 if c > 128 else _round_up(c, 8)
        c_pad = _round_up(c, tc)

    # --- N (batch / parallel) tiling.
    tn_cap = max(8, tn_budget(tc))
    if n <= 8:
        tn = n                                   # one full-N tile (block == full dim)
    else:
        # >= 2 batch tiles (feeds both TensorCores on v7x), multiple of 8, within budget.
        tn = min(tn_cap, _round_up(-(-n // 2), 8), 512)
        tn = max(8, (tn // 8) * 8)
    return tn, tc, c_pad


# --------------------------------------------------------------------------- #
# Wrapper
# --------------------------------------------------------------------------- #
def classification_layer(x_nchw, weight_oc, bias_o):
    """Pallas implementation of ClassificationLayer.forward (eval mode).

    x_nchw:    (N, C, H, W)
    weight_oc: (O, C)   -- PyTorch nn.Linear weight layout
    bias_o:    (O,)
    returns:   (N, O)
    """
    n, c, h, w_dim = x_nchw.shape
    o = weight_oc.shape[0]
    hw = h * w_dim

    o_pad = _round_up(o, 128)                       # lane-dense output block
    x_bytes = jnp.dtype(x_nchw.dtype).itemsize
    w_bytes = jnp.dtype(weight_oc.dtype).itemsize
    out_bytes = x_bytes

    # Generation-aware VMEM budget (v7x: 64 MiB/TC; v5e/v6e: 128 MiB).
    try:
        vmem_cap = int(pltpu.get_tpu_info().vmem_capacity_bytes)
    except Exception:
        vmem_cap = 64 * 1024 * 1024                 # conservative default
    vmem_limit = max(int(vmem_cap * 0.70), 32 * 1024 * 1024)
    solve_budget = int(vmem_limit * 0.85)           # headroom for pipeline internals

    tn, tc, c_pad = _choose_tiles(n, c, hw, o_pad, x_bytes, w_bytes, out_bytes,
                                  solve_budget)
    grid = (pl.cdiv(n, tn), c_pad // tc)

    # ---- layout plumbing ----------------------------------------------------
    # Copy-free reshape of x; no padding along N (the partial last batch tile is
    # handled by Pallas' masked boundary blocks); C padded only in the fallback.
    x_flat = x_nchw.reshape(n, c, hw)
    if c_pad != c:
        x_flat = jnp.pad(x_flat, ((0, 0), (0, c_pad - c), (0, 0)))

    # One-time (tiny) weight transform: (O, C) -> (C, O), fold 1/HW, pad to
    # (c_pad, o_pad).  Keeps the in-kernel contraction natural and the finalize short.
    inv_hw = 1.0 / float(hw)
    w_t = (weight_oc.astype(jnp.float32).T * inv_hw).astype(weight_oc.dtype)
    w_t = jnp.pad(w_t, ((0, c_pad - c), (0, o_pad - o)))
    b_2d = jnp.pad(bias_o, (0, o_pad - o)).reshape(1, o_pad)

    out = pl.pallas_call(
        _gap_fc_kernel,
        out_shape=jax.ShapeDtypeStruct((n, o_pad), x_nchw.dtype),
        grid_spec=pltpu.PrefetchScalarGridSpec(
            num_scalar_prefetch=0,
            grid=grid,
            in_specs=[
                pl.BlockSpec((tn, tc, hw), lambda i, k: (i, k, 0)),
                pl.BlockSpec((tc, o_pad), lambda i, k: (k, 0)),
                pl.BlockSpec((1, o_pad), lambda i, k: (0, 0)),
            ],
            out_specs=pl.BlockSpec((tn, o_pad), lambda i, k: (i, 0)),
            scratch_shapes=[pltpu.VMEM((tn, o_pad), jnp.float32)],
        ),
        compiler_params=pltpu.CompilerParams(
            dimension_semantics=("parallel", "arbitrary"),
            vmem_limit_bytes=vmem_limit,
        ),
    )(x_flat, w_t, b_2d)

    return out[:, :o]


# --------------------------------------------------------------------------- #
# Reference + tests
# --------------------------------------------------------------------------- #
def _reference(x, weight, bias):
    xf = x.astype(jnp.float32)
    return xf.mean(axis=(2, 3)) @ weight.astype(jnp.float32).T + bias.astype(jnp.float32)


def _make_inputs(key, n, c, h, w, o, dtype):
    kx, kw, kb = jax.random.split(key, 3)
    x = jax.random.normal(kx, (n, c, h, w), dtype=jnp.float32).astype(dtype)
    bound = 1.0 / float(c) ** 0.5
    weight = jax.random.uniform(kw, (o, c), minval=-bound, maxval=bound,
                                dtype=jnp.float32).astype(dtype)
    bias = jax.random.uniform(kb, (o,), minval=-bound, maxval=bound,
                              dtype=jnp.float32).astype(dtype)
    return x, weight, bias


if __name__ == "__main__":
    key = jax.random.PRNGKey(0)
    k1, k2, k3, k4 = jax.random.split(key, 4)

    # 1) Small shapes consistent with the module (single tile, full C).
    x, w, b = _make_inputs(k1, 2, 4, 16, 16, 8, jnp.float32)
    y = classification_layer(x, w, b)
    jax.block_until_ready(y)
    ref = _reference(x, w, b)
    assert y.shape == ref.shape
    assert jnp.allclose(y.astype(jnp.float32), ref, atol=1e-4, rtol=1e-4), \
        "mismatch vs reference (small)"

    # 2) Wider C with O padding (full-C tile, divisor-friendly, no x padding).
    x2, w2, b2 = _make_inputs(k2, 4, 640, 7, 7, 10, jnp.float32)
    y2 = classification_layer(x2, w2, b2)
    jax.block_until_ready(y2)
    ref2 = _reference(x2, w2, b2)
    assert jnp.allclose(y2.astype(jnp.float32), ref2, atol=1e-4, rtol=1e-4), \
        "mismatch vs reference (C=640)"

    # 3) Multiple batch tiles with a partial (masked) last tile -- no N padding.
    x3, w3, b3 = _make_inputs(k3, 20, 96, 7, 7, 10, jnp.float32)
    y3 = classification_layer(x3, w3, b3)
    jax.block_until_ready(y3)
    ref3 = _reference(x3, w3, b3)
    assert jnp.allclose(y3.astype(jnp.float32), ref3, atol=1e-4, rtol=1e-4), \
        "mismatch vs reference (partial batch tile)"

    # 4) bf16 path: weight stays bf16 on the MXU, pooled operand downcast in-kernel.
    x4, w4, b4 = _make_inputs(k4, 2, 4, 16, 16, 8, jnp.bfloat16)
    y4 = classification_layer(x4, w4, b4)
    jax.block_until_ready(y4)
    ref4 = _reference(x4, w4, b4)
    assert jnp.allclose(y4.astype(jnp.float32), ref4, atol=3e-2, rtol=5e-2), \
        "mismatch vs reference (bf16)"

    print("KERNEL_OK")
</pallas_src>

<mosaic_0001>
module attributes {stable_mosaic.version = 11 : i64} {
  func.func @_gap_fc_kernel(%arg0: i32, %arg1: i32, %arg2: memref<2x4x256xf32, #tpu.memory_space<vmem>>, %arg3: memref<4x128xf32, #tpu.memory_space<vmem>>, %arg4: memref<1x128xf32, #tpu.memory_space<vmem>>, %arg5: memref<2x128xf32, #tpu.memory_space<vmem>>, %arg6: memref<2x128xf32, #tpu.memory_space<vmem>>) attributes {dimension_semantics = [#tpu.dimension_semantics<parallel>, #tpu.dimension_semantics<arbitrary>], iteration_bounds = array<i64: 1, 1>, scalar_prefetch = 0 : i64, scratch_operands = 1 : i64, tpu.core_type = #tpu.core_type<tc>, window_params = [{transform_indices = @transform_0, window_bounds = array<i64: 2, 4, 256>}, {transform_indices = @transform_1, window_bounds = array<i64: 4, 128>}, {pipeline_mode = #tpu.pipeline_mode<synchronous>, transform_indices = @transform_2, window_bounds = array<i64: 1, 128>}, {transform_indices = @transform_3, window_bounds = array<i64: 2, 128>}]} {
    %c0_i32 = arith.constant 0 : i32
    %0 = arith.cmpi eq, %arg1, %c0_i32 : i32
    %1 = arith.extui %0 : i1 to i32
    %c0_i32_0 = arith.constant 0 : i32
    %2 = arith.cmpi ne, %1, %c0_i32_0 : i32
    scf.if %2 {
      %cst_12 = arith.constant 0.000000e+00 : f32
      %13 = vector.broadcast %cst_12 : f32 to vector<2x128xf32>
      %c0_13 = arith.constant 0 : index
      %c0_14 = arith.constant 0 : index
      %14 = vector.load %arg6[%c0_13, %c0_14] : memref<2x128xf32, #tpu.memory_space<vmem>>, vector<2x128xf32>
      tpu.vector_store %arg6[%c0_13, %c0_14], %13 {strides = array<i32>} : memref<2x128xf32, #tpu.memory_space<vmem>>, vector<2x128xf32>,
    } else {
    }
    %c0 = arith.constant 0 : index
    %c0_1 = arith.constant 0 : index
    %c0_2 = arith.constant 0 : index
    %3 = vector.load %arg2[%c0, %c0_1, %c0_2] : memref<2x4x256xf32, #tpu.memory_space<vmem>>, vector<2x4x256xf32>
    %cst = arith.constant dense<0.000000e+00> : vector<2x4xf32>
    %4 = vector.multi_reduction <add>, %3, %cst [2] : vector<2x4x256xf32> to vector<2x4xf32>
    %c0_3 = arith.constant 0 : index
    %c0_4 = arith.constant 0 : index
    %5 = vector.load %arg3[%c0_3, %c0_4] : memref<4x128xf32, #tpu.memory_space<vmem>>, vector<4x128xf32>
    %c0_5 = arith.constant 0 : index
    %c0_6 = arith.constant 0 : index
    %6 = vector.load %arg6[%c0_5, %c0_6] : memref<2x128xf32, #tpu.memory_space<vmem>>, vector<2x128xf32>
    %cst_7 = arith.constant dense<0.000000e+00> : vector<2x128xf32>
    %7 = tpu.matmul %4, %5, %cst_7 {dimension_numbers = #tpu.dot_dimension_numbers<[1], [0], [0], [1], [0, 0, 1, 1], [], []>} : vector<2x4xf32>, vector<4x128xf32>, vector<2x128xf32> -> vector<2x128xf32>
    %8 = arith.addf %6, %7 : vector<2x128xf32>
    %c0_8 = arith.constant 0 : index
    %c0_9 = arith.constant 0 : index
    %9 = vector.load %arg6[%c0_8, %c0_9] : memref<2x128xf32, #tpu.memory_space<vmem>>, vector<2x128xf32>
    tpu.vector_store %arg6[%c0_8, %c0_9], %8 {strides = array<i32>} : memref<2x128xf32, #tpu.memory_space<vmem>>, vector<2x128xf32>,
    %c0_i32_10 = arith.constant 0 : i32
    %10 = arith.cmpi eq, %arg1, %c0_i32_10 : i32
    %11 = arith.extui %10 : i1 to i32
    %c0_i32_11 = arith.constant 0 : i32
    %12 = arith.cmpi ne, %11, %c0_i32_11 : i32
    scf.if %12 {
      %c0_12 = arith.constant 0 : index
      %c0_13 = arith.constant 0 : index
      %13 = vector.load %arg6[%c0_12, %c0_13] : memref<2x128xf32, #tpu.memory_space<vmem>>, vector<2x128xf32>
      %c0_14 = arith.constant 0 : index
      %c0_15 = arith.constant 0 : index
      %14 = vector.load %arg4[%c0_14, %c0_15] : memref<1x128xf32, #tpu.memory_space<vmem>>, vector<1x128xf32>
      %15 = vector.broadcast %14 : vector<1x128xf32> to vector<2x128xf32>
      %16 = arith.addf %13, %15 : vector<2x128xf32>
      %c0_16 = arith.constant 0 : index
      %c0_17 = arith.constant 0 : index
      %17 = vector.load %arg5[%c0_16, %c0_17] : memref<2x128xf32, #tpu.memory_space<vmem>>, vector<2x128xf32>
      tpu.vector_store %arg5[%c0_16, %c0_17], %16 {strides = array<i32>} : memref<2x128xf32, #tpu.memory_space<vmem>>, vector<2x128xf32>,
    } else {
    }
    return
  }
  func.func @transform_0(%arg0: i32, %arg1: i32) -> (i32, i32, i32) {
    %c0_i32 = arith.constant 0 : i32
    %c0_i32_0 = arith.constant 0 : i32
    return %arg0, %arg1, %c0_i32 : i32, i32, i32
  }
  func.func @transform_1(%arg0: i32, %arg1: i32) -> (i32, i32) {
    %c0_i32 = arith.constant 0 : i32
    %c0_i32_0 = arith.constant 0 : i32
    return %arg1, %c0_i32 : i32, i32
  }
  func.func @transform_2(%arg0: i32, %arg1: i32) -> (i32, i32) {
    %c0_i32 = arith.constant 0 : i32
    %c0_i32_0 = arith.constant 0 : i32
    %c0_i32_1 = arith.constant 0 : i32
    return %c0_i32, %c0_i32_0 : i32, i32
  }
  func.func @transform_3(%arg0: i32, %arg1: i32) -> (i32, i32) {
    %c0_i32 = arith.constant 0 : i32
    %c0_i32_0 = arith.constant 0 : i32
    return %arg0, %c0_i32 : i32, i32
  }
}

</mosaic_0001>

<bundles_post_ra>
// kernel: tpu_custom_call.1
= control target key start
LH: loop header
LB: loop body
LE: loop exit
PB: predicated region body
PF: predicated region fallthrough
CT: control target
= control target key end

     0   :  { %8 = vsyncpa [#allocation4], 0  ;;  %s317_s0 = inlined_call_operand.hbm [shape: f32[2,4,256], index: 0, kind: input, shape index: {}]   ;;  %s318_s1 = inlined_call_operand.hbm [shape: f32[4,128], index: 1, kind: input, shape index: {}]   ;;  %s319_s2 = inlined_call_operand.vmem [shape: f32[1,128], index: 2, kind: input, shape index: {}]   ;;  %s320_s3 = inlined_call_operand.hbm [shape: f32[2,128], index: 3, kind: output, shape index: {}]  }
   0x1   :  { %9 = vsyncpa [#allocation7], 0 }
   0x2   :  { %10 = vsyncpa [#allocation5], 0  ;;  %s273_s12 = smov [#allocation3]  }
   0x3   :  { %s16_s13 = sshll.u32 %s273_s12, 4  ;;  %s17_s13 = int_to_ptr.vmem [resolvable:$true] %s16_s13 }
   0x4   :  { %s215_s14 = scalar_lea.vmem %s17_s13, 256  ;;  %p220_p1 = scmp.lt.s32.totalorder %s17_s13, %s17_s13 }
   0x5   :  { %p216_p0 = scmp.ne.s32.totalorder %s17_s13, %s215_s14  ;;  %p221_p2 = scmp.lt.s32.totalorder %s215_s14, %s215_s14 }
   0x7   :  { %p222_p3 = por %p221_p2, %p220_p1 }
   0x9   :  { %p223_p4 = pnand %p222_p3, %p216_p0 }
   0xb   :  { %226 = shalt.err (!%p223_p4)
}
   0xc   :  { %s274_s15 = smov 128   ;;  %s275_s16 = smov 8  }
   0xd   :  { %22 = dma.hbm_to_vmem [thread:$0]  %s317_s0, 256, %s17_s13, [#allocation4], %s274_s15, %s274_s15, %s275_s16  }
   0xe   :  { %s276_s19 = smov [#allocation6]  }
   0xf   :  { %s29_s20 = sshll.u32 %s276_s19, 4  ;;  %s30_s20 = int_to_ptr.vmem [resolvable:$true] %s29_s20 }
  0x10   :  { %s235_s21 = scalar_lea.vmem %s30_s20, 64  ;;  %p240_p6 = scmp.lt.s32.totalorder %s30_s20, %s30_s20 }
  0x11   :  { %p236_p5 = scmp.ne.s32.totalorder %s30_s20, %s235_s21  ;;  %p241_p7 = scmp.lt.s32.totalorder %s235_s21, %s235_s21 }
  0x13   :  { %p242_p8 = por %p241_p7, %p240_p6 }
  0x15   :  { %p243_p9 = pnand %p242_p8, %p236_p5 }
  0x17   :  { %246 = shalt.err (!%p243_p9)
}
  0x18   :  { %32 = dma.hbm_to_vmem [thread:$0]  %s318_s1, 64, %s30_s20, [#allocation7]  }
  0x19   :  { %267 = dma.done.wait [#allocation4], 256  }
  0x1a   :  { %268 = vsyncadd [#allocation4], 4294967040 }
  0x1b   :  { %269 = dma.done.wait [#allocation7], 64  }
  0x1c   :  { %270 = vsyncadd [#allocation7], 4294967232  ;;  %vm54_vm0 = vcmask 1043456   ;;  %v46_v0 = vld [vmem:[#allocation3] sm:$0xff]  ;;  %v47_v1 = vld [vmem:[#allocation3 + $0x8] sm:$0xff]  ;;  %v277_v11 = vmov 0.0   ;;  %v69_v12 = vlaneseq }
  0x1d   :  { %v50_v2 = vcombine.high %v46_v0, %v46_v0  ;;  %v55_v3 = vsel %vm54_vm0, %v46_v0, 0.0  ;;  %v51_v4 = vcombine.high %v47_v1, %v47_v1  ;;  %v60_v6 = vsel %vm54_vm0, %v47_v1, 0.0  ;;  %v65_v10 = vld [vmem:[#allocation6] sm:$0xf]  ;;  %45 = vst [vmem:[#allocation2] sm:$0x3] %v277_v11  ;;  %193 = vmatprep.subr.mxu0 %v277_v11 }
  0x1e   :  { %vm278_vm1 = vmmov 0   ;;  %194 = vmatpush3.msk.msra.mxu0 %vm54_vm0, %v65_v10  ;;  %v70_v13 = vand.u32 127, %v69_v12  ;;  %v72_v14 = vshrl.u32 %v69_v12, 7  ;;  %vm79_vm2 = vcmask 1041409   ;;  %v190_v25 = vld [vmem:[%s319_s2] ss:$0 sm:$0xff] }
  0x1f   :  { %v56_v5 = vsel %vm54_vm0, %v50_v2, 0.0  ;;  %v61_v7 = vsel %vm54_vm0, %v51_v4, 0.0  ;;  %195 = vmatprep.mubr.msk.f32.mxu0 %vm278_vm1, %v277_v11  ;;  %vm81_vm3 = vcmask 31744   ;;  %s279_s24 = smov [#allocation8]  }
  0x20   :  { %v57_v8 = vadd.f32 %v56_v5, %v55_v3  ;;  %v62_v9 = vadd.f32 %v61_v7, %v60_v6  ;;  %v73_v16 = vsub.s32 %v70_v13, %v72_v14  ;;  %s178_s25 = sshll.u32 %s279_s24, 4  ;;  %s179_s25 = int_to_ptr.vmem [resolvable:$true] %s178_s25 }
  0x21   :  { %s247_s26 = scalar_lea.vmem %s179_s25, 32  ;;  %p252_p11 = scmp.lt.s32.totalorder %s179_s25, %s179_s25 }
  0x22   :  { %58 = vadd.xlane.f32.xlu0 %v57_v8  ;;  %p248_p10 = scmp.ne.s32.totalorder %s179_s25, %s247_s26  ;;  %p253_p12 = scmp.lt.s32.totalorder %s247_s26, %s247_s26 }
  0x24   :  { %v66_v21 = vld [vmem:[#allocation2] sm:$0x3]  ;;  %p254_p13 = por %p253_p12, %p252_p11 }
  0x26   :  { %63 = vadd.xlane.f32.xlu0 %v62_v9  ;;  %p255_p0 = pnand %p254_p13, %p248_p10 }
  0xab   :  { %v59_v15 = vpop.xlane.xlu0 %58 }
  0xac   :  { %v74_v18 = vrot.slane %v59_v15, %v73_v16 }
  0xaf   :  { %v64_v17 = vpop.xlane.xlu0 %63 }
  0xb0   :  { %v78_v19 = vrot.slane %v64_v17, %v73_v16 }
  0xb2   :  { %v80_v20 = vsel %vm79_vm2, %v78_v19, %v74_v18 }
  0xb3   :  { %196 = vmatmul.mubr.msk.f32.vlgmr.msra.gmra.mxu0 %vm81_vm3, %v80_v20 }
 0x173   :  { %v153_v22 = vpop.f32.mrf.mxu0 }
 0x174   :  { %v157_v23 = vadd.f32 %v153_v22, %v66_v21 }
 0x175   :  { %v197_v24 = vpop.f32.mrf.mxu0 }
 0x176   :  { %158 = vst [vmem:[#allocation2] sm:$0x3] %v157_v23 }
 0x17d   :  { %v162_v26 = vld [vmem:[#allocation2] sm:$0x3] }
 0x17e   :  { %v170_v27 = vadd.f32 %v190_v25, %v162_v26 }
 0x180   :  { %171 = vst [vmem:[#allocation8] sm:$0x3] %v170_v27 }
 0x181   :  { %258 = shalt.err (!%p255_p0)
}
 0x182   :  { %181 = dma.vmem_to_hbm [thread:$0]  %s179_s25, 32, %s320_s3, [#allocation5]  }
 0x183   :  { %271 = dma.done.wait [#allocation5], 32  }
 0x184   :  { %272 = vsyncadd [#allocation5], 4294967264 }
 0x185   :  { %185 = vsyncpa [#allocation4], 1 }
 0x186   :  { %186 = vsyncpa [#allocation7], 1 }
 0x187   :  { %187 = vsyncpa [#allocation5], 1 }

</bundles_post_ra>
